<compile_context>
chip_gen: v5e
topology: v5e:2x2
jax: 0.10.0
libtpu: 0.0.40
codegen_flags: <defaults>
</compile_context>

<pallas_src>
import functools

import jax
import jax.numpy as jnp
from jax import lax
from jax.experimental import pallas as pl
from jax.experimental.pallas import tpu as pltpu


# ----------------------------------------------------------------------------
# Pallas kernel: batched per-sample crop grid_sample (channel-fused lanes)
# ----------------------------------------------------------------------------
def _crop_grid_sample_kernel(theta_ref, x_ref, o_ref, *, bs, bt, C, H, W):
    """One grid step processes `bt` output samples sharing one source block.

    theta_ref: SMEM [3, N]        rows = (tx, ty, scale) per output sample
    x_ref:     VMEM [bt, H, C*W]  source images, channel folded into lanes
    o_ref:     VMEM [bt, H, C*W]  resampled outputs, same fused layout
    """
    jb = pl.program_id(0)          # batch-tile index (source images)
    cc = pl.program_id(1)          # copy index
    f32 = jnp.float32
    CW = C * W

    # ---- theta-independent pieces, hoisted out of the per-sample loop ------
    # Ry coordinate grids: [H_out, H_in]
    v = lax.broadcasted_iota(jnp.int32, (H, H), 0).astype(f32)
    irow = lax.broadcasted_iota(jnp.int32, (H, H), 1).astype(f32)
    y_out = -1.0 + 2.0 * v / float(max(H - 1, 1))        # align_corners=True
    half_h = 0.5 * float(H - 1)

    # Block-diagonal Rx grids over fused (channel, width) lanes: [CW_in, CW_out]
    p = lax.broadcasted_iota(jnp.int32, (CW, CW), 0).astype(f32)   # in  (c,w)
    q = lax.broadcasted_iota(jnp.int32, (CW, CW), 1).astype(f32)   # out (c,w)
    inv_w = 1.0 / float(W)
    c_p = jnp.floor((p + 0.5) * inv_w)                   # channel of input lane
    c_q = jnp.floor((q + 0.5) * inv_w)                   # channel of output lane
    w_p = p - c_p * float(W)                             # input col within chan
    w_q = q - c_q * float(W)                             # output col within chan
    same_c = c_p == c_q
    x_out = -1.0 + 2.0 * w_q / float(max(W - 1, 1))      # align_corners=True
    half_w = 0.5 * float(W - 1)

    for k in range(bt):            # bt is small & static -> unrolled
        n = cc * bs + jb * bt + k  # flat output-sample index (torch.tile order)
        tx = theta_ref[0, n]
        ty = theta_ref[1, n]
        s = theta_ref[2, n]

        # Ry[v, i] = relu(1 - |py[v] - i|)   (bilinear row weights)
        py = (s * y_out + (ty + 1.0)) * half_h
        ry = jnp.maximum(0.0, 1.0 - jnp.abs(py - irow))            # [Ho, Hin]

        # Block-diag Rx^T over fused lanes:
        #   B[(c, w_in), (c', w_out)] = [c==c'] * relu(1 - |px[w_out] - w_in|)
        px = (s * x_out + (tx + 1.0)) * half_w
        bmat = jnp.where(same_c,
                         jnp.maximum(0.0, 1.0 - jnp.abs(px - w_p)),
                         0.0)                                      # [CW, CW]

        xk = x_ref[k].astype(f32)                                  # [H, C*W]
        t = jnp.dot(ry, xk, preferred_element_type=f32)            # [Ho, C*W]
        out = jnp.dot(t, bmat, preferred_element_type=f32)         # [Ho, C*W]
        o_ref[k] = out.astype(o_ref.dtype)                         # wide store


def _pick_batch_tile(bs, n_copies, bytes_per_sample,
                     vmem_budget=4 * 1024 * 1024, bt_max=16):
    """Largest divisor of bs fitting the VMEM budget (double-buffered in+out)
    while leaving >=2 total grid steps so a second TensorCore (v7x) has work."""
    cap = max(1, min(bt_max, vmem_budget // max(1, 4 * bytes_per_sample)))
    divisors = [d for d in range(1, bs + 1) if bs % d == 0 and d <= cap] or [1]
    good = [d for d in divisors if (bs // d) * n_copies >= 2]
    return max(good) if good else max(divisors)


def crop_grid_sample(x, theta, n_copies):
    """x: [bs, C, H, W]; theta: [3, n_copies*bs] rows = (tx, ty, scale).

    Output row n crops source image (n % bs) with theta[:, n] — identical to
    torch.tile(x,[n_copies,1,1,1]) + F.affine_grid + F.grid_sample ordering.
    """
    bs, C, H, W = x.shape
    N = n_copies * bs
    dtype = x.dtype

    bytes_per_sample = C * H * W * dtype.itemsize
    bt = _pick_batch_tile(bs, n_copies, bytes_per_sample)
    n_batch_tiles = bs // bt

    # Layout plumbing (wrapper side): fold channels into the lane dimension.
    x_hcw = jnp.transpose(x, (0, 2, 1, 3)).reshape(bs, H, C * W)

    kernel = functools.partial(_crop_grid_sample_kernel,
                               bs=bs, bt=bt, C=C, H=H, W=W)

    out_hcw = pl.pallas_call(
        kernel,
        out_shape=jax.ShapeDtypeStruct((N, H, C * W), dtype),
        grid=(n_batch_tiles, n_copies),
        in_specs=[
            # theta [3, N] lives whole in SMEM (long axis last -> no pad blowup)
            pl.BlockSpec(memory_space=pltpu.MemorySpace.SMEM),
            # same source block for every copy -> fetched once per batch tile
            pl.BlockSpec((bt, H, C * W), lambda jb, cc: (jb, 0, 0)),
        ],
        out_specs=pl.BlockSpec((bt, H, C * W),
                               lambda jb, cc: (cc * n_batch_tiles + jb, 0, 0)),
        compiler_params=pltpu.CompilerParams(
            dimension_semantics=("parallel", "parallel"),
            vmem_limit_bytes=32 * 1024 * 1024),
    )(theta, x_hcw)

    # [N, H, C*W] -> [N, C, H, W]
    return jnp.transpose(out_hcw.reshape(N, H, C, W), (0, 2, 1, 3))


# ----------------------------------------------------------------------------
# Module (JAX glue around the kernel)
# ----------------------------------------------------------------------------
def make_crop_tables(sizes, nums):
    """Replicates the centers_crop / scopes_crop construction in __init__."""
    centers, scopes = [], []
    for size, num in zip(sizes, nums):
        center_interval = 0.0 if num == 1 else (1.0 - size) / (num - 1) * 2.0
        center_lower = size - 1.0
        for j1 in range(num):
            for j2 in range(num):
                centers.append([center_lower + center_interval * j1,
                                center_lower + center_interval * j2])
                scopes.append(size)
    return (jnp.asarray(centers, jnp.float32),        # [K, 2]
            jnp.asarray(scopes, jnp.float32))         # [K]


def generators_crop(weights):
    """Generators.crop: weights [N,3]=(tx,ty,size) -> affine matrices [N,3,3]."""
    n = weights.shape[0]
    zeros = jnp.zeros((n,), weights.dtype)
    ones = jnp.ones((n,), weights.dtype)
    row0 = jnp.stack([weights[:, 2], zeros, weights[:, 0]], axis=-1)
    row1 = jnp.stack([zeros, weights[:, 2], weights[:, 1]], axis=-1)
    row2 = jnp.stack([zeros, zeros, ones], axis=-1)
    return jnp.stack([row0, row1, row2], axis=1)


class AugmentationOutSourceParam:
    """JAX/Pallas port of Augmentation_Out_Source_Param (transform='crop')."""

    def __init__(self, cfg, transform="crop"):
        self.transform = transform
        self.centers, self.scopes = make_crop_tables(cfg["sizes"], cfg["nums"])
        self.num_crops = self.centers.shape[0]

    def _dist_crop(self, params, n_copies, key, tta_train):
        # Cropping_Categorical_tta_only_Dist_ConvFeature: categorical over the
        # flat crop table using externally supplied logits `params` [bs, K].
        # TODO(synk): original distribution class is external; only the
        # categorical sampling over the crop table is modeled here.
        bs = params.shape[0]
        logp = jax.nn.log_softmax(params, axis=-1)                    # [bs, K]
        if tta_train:
            sample_id = jax.random.categorical(key, params, axis=-1,
                                               shape=(n_copies, bs))  # [nc, bs]
        else:
            sample_id = jnp.broadcast_to(jnp.argmax(params, axis=-1),
                                         (n_copies, bs))
        sample_logit = jnp.take_along_axis(
            logp, sample_id.T, axis=-1).T                             # [nc, bs]
        ctr = self.centers[sample_id]                                 # [nc, bs, 2]
        siz = self.scopes[sample_id][..., None]                       # [nc, bs, 1]
        weights = jnp.concatenate([ctr, siz], axis=-1)                # [nc, bs, 3]
        return (jnp.swapaxes(weights, 0, 1),                          # [bs, nc, 3]
                sample_logit.reshape(-1),
                sample_id.reshape(-1))

    def forward_tta_only(self, x, params, n_copies=1, tta_train=True, key=None):
        if key is None:
            # TODO(synk): default key means repeated calls draw identical crops;
            # pass an explicit key in real use.
            key = jax.random.PRNGKey(0)

        weights, sample_logit, sample_id = self._dist_crop(
            params, n_copies, key, tta_train)
        # [bs, nc, 3] -> [nc, bs, 3] -> [N, 3]  (copy-major = torch.tile order)
        weights = jnp.swapaxes(weights, 0, 1).reshape(-1, weights.shape[2])

        # Generators loop (only 'crop'): weights_dim('crop') == 3
        affine_matrices = generators_crop(weights)                    # [N,3,3]
        aff = affine_matrices[:, :2, :]                               # [N,2,3]
        theta = jnp.stack([aff[:, 0, 2], aff[:, 1, 2], aff[:, 0, 0]],
                          axis=0)                                     # [3, N]

        # F.affine_grid + F.grid_sample fused into the Pallas kernel; the
        # tiled input is never materialized.
        x_out = crop_grid_sample(x, theta, n_copies)
        return x_out, sample_logit, sample_id

    __call__ = forward_tta_only


# ----------------------------------------------------------------------------
# Pure-JAX reference (tile + affine_grid + bilinear grid_sample) for checking
# ----------------------------------------------------------------------------
def _reference_crop_grid_sample(x, theta, n_copies):
    bs, C, H, W = x.shape
    tx, ty, s = theta[0], theta[1], theta[2]                         # [N]
    xo = -1.0 + 2.0 * jnp.arange(W, dtype=jnp.float32) / max(W - 1, 1)
    yo = -1.0 + 2.0 * jnp.arange(H, dtype=jnp.float32) / max(H - 1, 1)
    px = (s[:, None] * xo[None, :] + tx[:, None] + 1.0) * (0.5 * (W - 1))
    py = (s[:, None] * yo[None, :] + ty[:, None] + 1.0) * (0.5 * (H - 1))
    rx = jnp.maximum(0.0, 1.0 - jnp.abs(
        px[:, :, None] - jnp.arange(W, dtype=jnp.float32)[None, None, :]))
    ry = jnp.maximum(0.0, 1.0 - jnp.abs(
        py[:, :, None] - jnp.arange(H, dtype=jnp.float32)[None, None, :]))
    xt = jnp.tile(x, (n_copies, 1, 1, 1)).astype(jnp.float32)
    out = jnp.einsum("nvi,nciw,nuw->ncvu", ry, xt, rx,
                     precision=lax.Precision.HIGHEST)
    return out.astype(x.dtype)


# ----------------------------------------------------------------------------
if __name__ == "__main__":
    cfg = {"sizes": [1.0, 0.75, 0.5], "nums": [1, 2, 3]}   # K = 1 + 4 + 9 = 14
    module = AugmentationOutSourceParam(cfg, transform="crop")

    bs, C, H, W = 2, 4, 16, 16
    n_copies = 2

    key = jax.random.PRNGKey(0)
    kx, kp, ks = jax.random.split(key, 3)
    x = jax.random.normal(kx, (bs, C, H, W), dtype=jnp.float32)
    params = jax.random.normal(kp, (bs, module.num_crops), dtype=jnp.float32)

    x_out, sample_logit, sample_id = module.forward_tta_only(
        x, params, n_copies=n_copies, tta_train=True, key=ks)
    jax.block_until_ready((x_out, sample_logit, sample_id))

    assert x_out.shape == (n_copies * bs, C, H, W)
    assert sample_logit.shape == (n_copies * bs,)
    assert sample_id.shape == (n_copies * bs,)
    assert bool(jnp.all(jnp.isfinite(x_out)))

    # Check the fused Pallas affine_grid + grid_sample against a pure-JAX ref
    # (same key -> identical crop samples).
    w_ref, _, _ = module._dist_crop(params, n_copies, ks, True)
    w_ref = jnp.swapaxes(w_ref, 0, 1).reshape(-1, 3)                 # [N, 3]
    theta_ref = jnp.stack([w_ref[:, 0], w_ref[:, 1], w_ref[:, 2]], axis=0)
    ref = _reference_crop_grid_sample(x, theta_ref, n_copies)
    max_err = float(jnp.max(jnp.abs(x_out - ref)))
    assert bool(jnp.allclose(x_out, ref, rtol=1e-3, atol=5e-3)), max_err

    print("KERNEL_OK")
</pallas_src>

<mosaic_0001>
module attributes {stable_mosaic.version = 11 : i64} {
  func.func @_crop_grid_sample_kernel(%arg0: i32, %arg1: i32, %arg2: memref<3x4xf32, #tpu.memory_space<smem>>, %arg3: memref<2x16x64xf32, #tpu.memory_space<vmem>>, %arg4: memref<2x16x64xf32, #tpu.memory_space<vmem>>) attributes {dimension_semantics = [#tpu.dimension_semantics<parallel>, #tpu.dimension_semantics<parallel>], iteration_bounds = array<i64: 1, 2>, scalar_prefetch = 0 : i64, scratch_operands = 0 : i64, tpu.core_type = #tpu.core_type<tc>, window_params = [{transform_indices = @transform_0, window_bounds = array<i64: 3, 4>}, {transform_indices = @transform_1, window_bounds = array<i64: 2, 16, 64>}, {transform_indices = @transform_2, window_bounds = array<i64: 2, 16, 64>}]} {
    %0 = tpu.iota {dimensions = array<i32: 0>} : vector<16x16xi32>
    %1 = arith.sitofp %0 : vector<16x16xi32> to vector<16x16xf32>
    %2 = tpu.iota {dimensions = array<i32: 1>} : vector<16x16xi32>
    %3 = arith.sitofp %2 : vector<16x16xi32> to vector<16x16xf32>
    %cst = arith.constant 2.000000e+00 : f32
    %4 = vector.broadcast %cst : f32 to vector<16x16xf32>
    %5 = arith.mulf %4, %1 : vector<16x16xf32>
    %cst_0 = arith.constant 1.500000e+01 : f32
    %6 = vector.broadcast %cst_0 : f32 to vector<16x16xf32>
    %7 = arith.divf %5, %6 : vector<16x16xf32>
    %cst_1 = arith.constant -1.000000e+00 : f32
    %8 = vector.broadcast %cst_1 : f32 to vector<16x16xf32>
    %9 = arith.addf %8, %7 : vector<16x16xf32>
    %10 = tpu.iota {dimensions = array<i32: 0>} : vector<64x64xi32>
    %11 = arith.sitofp %10 : vector<64x64xi32> to vector<64x64xf32>
    %12 = tpu.iota {dimensions = array<i32: 1>} : vector<64x64xi32>
    %13 = arith.sitofp %12 : vector<64x64xi32> to vector<64x64xf32>
    %cst_2 = arith.constant 5.000000e-01 : f32
    %14 = vector.broadcast %cst_2 : f32 to vector<64x64xf32>
    %15 = arith.addf %11, %14 : vector<64x64xf32>
    %cst_3 = arith.constant 6.250000e-02 : f32
    %16 = vector.broadcast %cst_3 : f32 to vector<64x64xf32>
    %17 = arith.mulf %15, %16 : vector<64x64xf32>
    %18 = math.floor %17 : vector<64x64xf32>
    %cst_4 = arith.constant 5.000000e-01 : f32
    %19 = vector.broadcast %cst_4 : f32 to vector<64x64xf32>
    %20 = arith.addf %13, %19 : vector<64x64xf32>
    %cst_5 = arith.constant 6.250000e-02 : f32
    %21 = vector.broadcast %cst_5 : f32 to vector<64x64xf32>
    %22 = arith.mulf %20, %21 : vector<64x64xf32>
    %23 = math.floor %22 : vector<64x64xf32>
    %cst_6 = arith.constant 1.600000e+01 : f32
    %24 = vector.broadcast %cst_6 : f32 to vector<64x64xf32>
    %25 = arith.mulf %18, %24 : vector<64x64xf32>
    %26 = arith.subf %11, %25 : vector<64x64xf32>
    %cst_7 = arith.constant 1.600000e+01 : f32
    %27 = vector.broadcast %cst_7 : f32 to vector<64x64xf32>
    %28 = arith.mulf %23, %27 : vector<64x64xf32>
    %29 = arith.subf %13, %28 : vector<64x64xf32>
    %30 = arith.cmpf oeq, %18, %23 : vector<64x64xf32>
    %cst_8 = arith.constant 2.000000e+00 : f32
    %31 = vector.broadcast %cst_8 : f32 to vector<64x64xf32>
    %32 = arith.mulf %31, %29 : vector<64x64xf32>
    %cst_9 = arith.constant 1.500000e+01 : f32
    %33 = vector.broadcast %cst_9 : f32 to vector<64x64xf32>
    %34 = arith.divf %32, %33 : vector<64x64xf32>
    %cst_10 = arith.constant -1.000000e+00 : f32
    %35 = vector.broadcast %cst_10 : f32 to vector<64x64xf32>
    %36 = arith.addf %35, %34 : vector<64x64xf32>
    %c2_i32 = arith.constant 2 : i32
    %37 = arith.muli %arg1, %c2_i32 : i32
    %c2_i32_11 = arith.constant 2 : i32
    %38 = arith.muli %arg0, %c2_i32_11 : i32
    %39 = arith.addi %37, %38 : i32
    %c0_i32 = arith.constant 0 : i32
    %40 = arith.addi %39, %c0_i32 : i32
    %c0 = arith.constant 0 : index
    %41 = arith.index_cast %40 : i32 to index
    %42 = memref.load %arg2[%c0, %41] : memref<3x4xf32, #tpu.memory_space<smem>>
    %c1 = arith.constant 1 : index
    %43 = arith.index_cast %40 : i32 to index
    %44 = memref.load %arg2[%c1, %43] : memref<3x4xf32, #tpu.memory_space<smem>>
    %c2 = arith.constant 2 : index
    %45 = arith.index_cast %40 : i32 to index
    %46 = memref.load %arg2[%c2, %45] : memref<3x4xf32, #tpu.memory_space<smem>>
    %47 = vector.broadcast %46 : f32 to vector<16x16xf32>
    %48 = arith.mulf %47, %9 : vector<16x16xf32>
    %cst_12 = arith.constant 1.000000e+00 : f32
    %49 = arith.addf %44, %cst_12 : f32
    %50 = vector.broadcast %49 : f32 to vector<16x16xf32>
    %51 = arith.addf %48, %50 : vector<16x16xf32>
    %cst_13 = arith.constant 7.500000e+00 : f32
    %52 = vector.broadcast %cst_13 : f32 to vector<16x16xf32>
    %53 = arith.mulf %51, %52 : vector<16x16xf32>
    %54 = arith.subf %53, %3 : vector<16x16xf32>
    %55 = math.absf %54 : vector<16x16xf32>
    %cst_14 = arith.constant 1.000000e+00 : f32
    %56 = vector.broadcast %cst_14 : f32 to vector<16x16xf32>
    %57 = arith.subf %56, %55 : vector<16x16xf32>
    %cst_15 = arith.constant 0.000000e+00 : f32
    %58 = vector.broadcast %cst_15 : f32 to vector<16x16xf32>
    %59 = arith.maximumf %58, %57 : vector<16x16xf32>
    %60 = vector.broadcast %46 : f32 to vector<64x64xf32>
    %61 = arith.mulf %60, %36 : vector<64x64xf32>
    %cst_16 = arith.constant 1.000000e+00 : f32
    %62 = arith.addf %42, %cst_16 : f32
    %63 = vector.broadcast %62 : f32 to vector<64x64xf32>
    %64 = arith.addf %61, %63 : vector<64x64xf32>
    %cst_17 = arith.constant 7.500000e+00 : f32
    %65 = vector.broadcast %cst_17 : f32 to vector<64x64xf32>
    %66 = arith.mulf %64, %65 : vector<64x64xf32>
    %67 = arith.subf %66, %26 : vector<64x64xf32>
    %68 = math.absf %67 : vector<64x64xf32>
    %cst_18 = arith.constant 1.000000e+00 : f32
    %69 = vector.broadcast %cst_18 : f32 to vector<64x64xf32>
    %70 = arith.subf %69, %68 : vector<64x64xf32>
    %cst_19 = arith.constant 0.000000e+00 : f32
    %71 = vector.broadcast %cst_19 : f32 to vector<64x64xf32>
    %72 = arith.maximumf %71, %70 : vector<64x64xf32>
    %cst_20 = arith.constant 0.000000e+00 : f32
    %73 = vector.broadcast %cst_20 : f32 to vector<64x64xf32>
    %74 = arith.select %30, %72, %73 : vector<64x64xi1>, vector<64x64xf32>
    %c0_21 = arith.constant 0 : index
    %c0_22 = arith.constant 0 : index
    %c0_23 = arith.constant 0 : index
    %75 = vector.load %arg3[%c0_21, %c0_22, %c0_23] : memref<2x16x64xf32, #tpu.memory_space<vmem>>, vector<1x16x64xf32>
    %76 = vector.shape_cast %75 : vector<1x16x64xf32> to vector<16x64xf32>
    %cst_24 = arith.constant dense<0.000000e+00> : vector<16x64xf32>
    %77 = tpu.matmul %59, %76, %cst_24 {dimension_numbers = #tpu.dot_dimension_numbers<[1], [0], [0], [1], [0, 0, 1, 1], [], []>} : vector<16x16xf32>, vector<16x64xf32>, vector<16x64xf32> -> vector<16x64xf32>
    %cst_25 = arith.constant dense<0.000000e+00> : vector<16x64xf32>
    %78 = tpu.matmul %77, %74, %cst_25 {dimension_numbers = #tpu.dot_dimension_numbers<[1], [0], [0], [1], [0, 0, 1, 1], [], []>} : vector<16x64xf32>, vector<64x64xf32>, vector<16x64xf32> -> vector<16x64xf32>
    %c0_26 = arith.constant 0 : index
    %c0_27 = arith.constant 0 : index
    %c0_28 = arith.constant 0 : index
    %79 = vector.load %arg4[%c0_26, %c0_27, %c0_28] : memref<2x16x64xf32, #tpu.memory_space<vmem>>, vector<1x16x64xf32>
    %80 = vector.shape_cast %79 : vector<1x16x64xf32> to vector<16x64xf32>
    %81 = vector.shape_cast %78 : vector<16x64xf32> to vector<1x16x64xf32>
    tpu.vector_store %arg4[%c0_26, %c0_27, %c0_28], %81 {strides = array<i32>} : memref<2x16x64xf32, #tpu.memory_space<vmem>>, vector<1x16x64xf32>,
    %c2_i32_29 = arith.constant 2 : i32
    %82 = arith.muli %arg1, %c2_i32_29 : i32
    %c2_i32_30 = arith.constant 2 : i32
    %83 = arith.muli %arg0, %c2_i32_30 : i32
    %84 = arith.addi %82, %83 : i32
    %c1_i32 = arith.constant 1 : i32
    %85 = arith.addi %84, %c1_i32 : i32
    %c0_31 = arith.constant 0 : index
    %86 = arith.index_cast %85 : i32 to index
    %87 = memref.load %arg2[%c0_31, %86] : memref<3x4xf32, #tpu.memory_space<smem>>
    %c1_32 = arith.constant 1 : index
    %88 = arith.index_cast %85 : i32 to index
    %89 = memref.load %arg2[%c1_32, %88] : memref<3x4xf32, #tpu.memory_space<smem>>
    %c2_33 = arith.constant 2 : index
    %90 = arith.index_cast %85 : i32 to index
    %91 = memref.load %arg2[%c2_33, %90] : memref<3x4xf32, #tpu.memory_space<smem>>
    %92 = vector.broadcast %91 : f32 to vector<16x16xf32>
    %93 = arith.mulf %92, %9 : vector<16x16xf32>
    %cst_34 = arith.constant 1.000000e+00 : f32
    %94 = arith.addf %89, %cst_34 : f32
    %95 = vector.broadcast %94 : f32 to vector<16x16xf32>
    %96 = arith.addf %93, %95 : vector<16x16xf32>
    %cst_35 = arith.constant 7.500000e+00 : f32
    %97 = vector.broadcast %cst_35 : f32 to vector<16x16xf32>
    %98 = arith.mulf %96, %97 : vector<16x16xf32>
    %99 = arith.subf %98, %3 : vector<16x16xf32>
    %100 = math.absf %99 : vector<16x16xf32>
    %cst_36 = arith.constant 1.000000e+00 : f32
    %101 = vector.broadcast %cst_36 : f32 to vector<16x16xf32>
    %102 = arith.subf %101, %100 : vector<16x16xf32>
    %cst_37 = arith.constant 0.000000e+00 : f32
    %103 = vector.broadcast %cst_37 : f32 to vector<16x16xf32>
    %104 = arith.maximumf %103, %102 : vector<16x16xf32>
    %105 = vector.broadcast %91 : f32 to vector<64x64xf32>
    %106 = arith.mulf %105, %36 : vector<64x64xf32>
    %cst_38 = arith.constant 1.000000e+00 : f32
    %107 = arith.addf %87, %cst_38 : f32
    %108 = vector.broadcast %107 : f32 to vector<64x64xf32>
    %109 = arith.addf %106, %108 : vector<64x64xf32>
    %cst_39 = arith.constant 7.500000e+00 : f32
    %110 = vector.broadcast %cst_39 : f32 to vector<64x64xf32>
    %111 = arith.mulf %109, %110 : vector<64x64xf32>
    %112 = arith.subf %111, %26 : vector<64x64xf32>
    %113 = math.absf %112 : vector<64x64xf32>
    %cst_40 = arith.constant 1.000000e+00 : f32
    %114 = vector.broadcast %cst_40 : f32 to vector<64x64xf32>
    %115 = arith.subf %114, %113 : vector<64x64xf32>
    %cst_41 = arith.constant 0.000000e+00 : f32
    %116 = vector.broadcast %cst_41 : f32 to vector<64x64xf32>
    %117 = arith.maximumf %116, %115 : vector<64x64xf32>
    %cst_42 = arith.constant 0.000000e+00 : f32
    %118 = vector.broadcast %cst_42 : f32 to vector<64x64xf32>
    %119 = arith.select %30, %117, %118 : vector<64x64xi1>, vector<64x64xf32>
    %c1_43 = arith.constant 1 : index
    %c0_44 = arith.constant 0 : index
    %c0_45 = arith.constant 0 : index
    %120 = vector.load %arg3[%c1_43, %c0_44, %c0_45] : memref<2x16x64xf32, #tpu.memory_space<vmem>>, vector<1x16x64xf32>
    %121 = vector.shape_cast %120 : vector<1x16x64xf32> to vector<16x64xf32>
    %cst_46 = arith.constant dense<0.000000e+00> : vector<16x64xf32>
    %122 = tpu.matmul %104, %121, %cst_46 {dimension_numbers = #tpu.dot_dimension_numbers<[1], [0], [0], [1], [0, 0, 1, 1], [], []>} : vector<16x16xf32>, vector<16x64xf32>, vector<16x64xf32> -> vector<16x64xf32>
    %cst_47 = arith.constant dense<0.000000e+00> : vector<16x64xf32>
    %123 = tpu.matmul %122, %119, %cst_47 {dimension_numbers = #tpu.dot_dimension_numbers<[1], [0], [0], [1], [0, 0, 1, 1], [], []>} : vector<16x64xf32>, vector<64x64xf32>, vector<16x64xf32> -> vector<16x64xf32>
    %c1_48 = arith.constant 1 : index
    %c0_49 = arith.constant 0 : index
    %c0_50 = arith.constant 0 : index
    %124 = vector.load %arg4[%c1_48, %c0_49, %c0_50] : memref<2x16x64xf32, #tpu.memory_space<vmem>>, vector<1x16x64xf32>
    %125 = vector.shape_cast %124 : vector<1x16x64xf32> to vector<16x64xf32>
    %126 = vector.shape_cast %123 : vector<16x64xf32> to vector<1x16x64xf32>
    tpu.vector_store %arg4[%c1_48, %c0_49, %c0_50], %126 {strides = array<i32>} : memref<2x16x64xf32, #tpu.memory_space<vmem>>, vector<1x16x64xf32>,
    return
  }
  func.func @transform_0(%arg0: i32, %arg1: i32) -> (i32, i32) {
    %c0_i32 = arith.constant 0 : i32
    %c0_i32_0 = arith.constant 0 : i32
    %c0_i32_1 = arith.constant 0 : i32
    return %c0_i32, %c0_i32_0 : i32, i32
  }
  func.func @transform_1(%arg0: i32, %arg1: i32) -> (i32, i32, i32) {
    %c0_i32 = arith.constant 0 : i32
    %c0_i32_0 = arith.constant 0 : i32
    %c0_i32_1 = arith.constant 0 : i32
    return %arg0, %c0_i32, %c0_i32_0 : i32, i32, i32
  }
  func.func @transform_2(%arg0: i32, %arg1: i32) -> (i32, i32, i32) {
    %c1_i32 = arith.constant 1 : i32
    %0 = arith.muli %arg1, %c1_i32 : i32
    %1 = arith.addi %0, %arg0 : i32
    %c0_i32 = arith.constant 0 : i32
    %c0_i32_0 = arith.constant 0 : i32
    %c0_i32_1 = arith.constant 0 : i32
    return %1, %c0_i32, %c0_i32_0 : i32, i32, i32
  }
}

</mosaic_0001>

<bundles_post_ra>
// kernel: tpu_custom_call.1
= control target key start
LH: loop header
LB: loop body
LE: loop exit
PB: predicated region body
PF: predicated region fallthrough
CT: control target
= control target key end

     0   :  { %7 = vsyncpa [#allocation5], 0  ;;  %s1277_s0 = inlined_call_operand.hbm [shape: f32[3,4], index: 0, kind: input, shape index: {}]   ;;  %s1278_s1 = inlined_call_operand.hbm [shape: f32[2,16,64], index: 1, kind: input, shape index: {}]   ;;  %s1279_s2 = inlined_call_operand.hbm [shape: f32[4,16,64], index: 2, kind: output, shape index: {}]  }
   0x1   :  { %8 = vsyncpa [#allocation3], 0 }
   0x2   :  { %9 = vsyncpa [#allocation4], 0 }
   0x3   :  { %11 = vsyncpa [#allocation4 + $0x1], 0  ;;  %s963_s9 = smov 0   ;;  %s965_s10 = smov 0  }
   0x4   :  { %s967_s11 = smov 0   ;;  %s969_s12 = smov 0  }
   0x5   :  { %s971_s13 = smov 0   ;;  %s973_s14 = smov 0  }
   0x6 LB: > { %s653_s15 = sadd.s32 4294967295, %s939_s14   ;;  %s654_s16 = sadd.s32 4294967294, %s939_s14   ;;  %s939_s14 = sphi %s973_s14, %s17_s14   ;;  %s935_s13 = sphi %s971_s13, %s1300_s13   ;;  %s931_s12 = sphi %s969_s12, %s1299_s12   ;;  %s927_s11 = sphi %s967_s11, %s1298_s11   ;;  %s923_s10 = sphi %s965_s10, %s1297_s10   ;;  %s919_s9 = sphi %s963_s9, %s1296_s9  }
   0x7   : > { %s26_s17 = sadd.s32 1, %s935_s13  ;;  %s85_s18 = sadd.s32 1, %s927_s11 }
   0x8   : > { %p27_p0 = scmp.ge.s32.totalorder %s26_s17, 2  ;;  %p95_p1 = scmp.ne.s32.totalorder %s927_s11, %s923_s10 }
   0x9   : > { %p96_p2 = scmp.eq.s32.totalorder %s653_s15, 1  ;;  %p101_p3 = scmp.ne.s32.totalorder %s923_s10, %s919_s9 }
   0xa   : > { %s1302_s17 = smov (%p27_p0, %s26_s17), 0  ;;  %p102_p5 = scmp.eq.s32.totalorder %s654_s16, 1 }
   0xb   : > { %p1003_p4 = por %p96_p2, %p95_p1  ;;  %s82_s20 = ssub.s32 %s935_s13, %s1302_s17 }
   0xc   : > { %p655_p6 = scmp.ge.s32.totalorder %s939_s14, 1  ;;  %p83_p7 = scmp.eq.s32.totalorder %s82_s20, 0 }
   0xd   : > { %p1010_p8 = por %p102_p5, %p101_p3  ;;  %p109_p9 = scmp.lt.s32.totalorder %s939_s14, 3 }
   0xe   : > { %s1016_s22 = scalar_select %p83_p7, %s927_s11, %s85_s18  }
   0xf   : > { %p1018_p10 = pnand %p655_p6, %p109_p9  ;;  %p1022_p11 = scmp.eq.s32.totalorder %s653_s15, 0 }
  0x10   : > { %s121_s27 = sshll.u32 %s1277_s0, 4  ;;  %s134_s30 = sshll.u32 %s1278_s1, 4  ;;  %s122_s27 = int_to_ptr.hbm [resolvable:$true] %s121_s27  ;;  %s135_s30 = int_to_ptr.hbm [resolvable:$true] %s134_s30 }
  0x11   : > { %p735_p12 = pneg %p1018_p10  ;;  %s941_s3 = smov [#allocation6]  }
  0x12   : > { %s136_s4 = sshll.u32 %s941_s3, 4  ;;  %s942_s5 = smov [#allocation2]   ;;  %s137_s4 = int_to_ptr.vmem [resolvable:$true] %s136_s4 }
  0x13   : > { %p736_p13 = pnand %p1022_p11, %p735_p12  ;;  %s943_s6 = smov 128  }
  0x14   : > { %s944_s7 = smov 8   ;;  %152 = sbr.rel (%p1018_p10) target bundleno = 341 (0x155), region = 28 }
  0x15   : > { %738 = dma.hbm_to_smem (!%p736_p13), %s122_s27, 64, %s942_s5, [#allocation5]  }
  0x16   : > { %741 = dma.hbm_to_vmem [thread:$0]  (!%p736_p13), %s135_s30, 512, %s137_s4, [#allocation3], %s943_s6, %s943_s6, %s944_s7  }
  0x19   : > { %906 = dma.done.wait (%p1022_p11), [#allocation5], 64  }
  0x1a   : > { %908 = vsyncadd (%p1022_p11), [#allocation5], 4294967232 }
  0x1b   : > { %910 = dma.done.wait (%p1022_p11), [#allocation3], 512  }
  0x1c   : > { %912 = vsyncadd (%p1022_p11), [#allocation3], 4294966784 }
  0x1d   : > { %164 = sfence }
  0x1e   : > { %v488_v0 = vld [vmem:[#allocation6 + $0x18] sm:$0xff]  ;;  %v487_v1 = vld [vmem:[#allocation6 + $0x10] sm:$0xff]  ;;  %v179_v2 = vlaneseq  ;;  %s1047_s8 = sshll.u32 %s931_s12, 1  ;;  %v945_v3 = vmov 15.0   ;;  %v347_v17 = vld [vmem:[#allocation6 + $0x8] sm:$0xff]  ;;  %vm348_vm1 = vcmask 130048  }
  0x1f   : > { %509 = vmatpush.msra.mxu2 %v488_v0  ;;  %806 = vrcp.f32 %v945_v3  ;;  %s410_s15 = sadd.s32 1, %s1047_s8  ;;  %s1051_s16 = sld [smem:[#allocation2 + %s1047_s8]]  ;;  %v346_v18 = vld [vmem:[#allocation6] sm:$0xff]  ;;  %369 = vmatpush.msra.mxu0 %v347_v17  ;;  %vm378_vm10 = vcmask 523264  }
  0x20   : > { %v1053_v4 = vshrl.u32 %v179_v2, 7  ;;  %v185_v5 = vand.u32 127, %v179_v2  ;;  %s1055_s18 = sld [smem:[#allocation2 + %s410_s15]]  ;;  %s412_s20 = sshra.s32 %s410_s15, 7 }
  0x21   : > { %510 = vmatpush.msra.mxu2 %v487_v1  ;;  %s703_s23 = sshll.u32 %s412_s20, 7  ;;  %s417_s24 = sand.u32 127, %s410_s15  ;;  %370 = vmatpush.msra.mxu0 %v346_v18 }
  0x22   : > { %v1057_v6 = vcvt.s32.f32 %v185_v5  ;;  %s704_s25 = sadd.s32 128, %s703_s23  ;;  %s706_s26 = sadd.s32 256, %s703_s23  ;;  %v181_v7 = vadd.s32 8, %v1053_v4  ;;  %v1061_v8 = vcvt.s32.f32 %v1053_v4  ;;  %v205_v19 = vadd.s32 56, %v1053_v4 }
  0x23   : > { %s418_s27 = sadd.s32 %s704_s25, %s417_s24  ;;  %s422_s28 = sadd.s32 %s706_s26, %s417_s24  ;;  %v1080_v20 = vadd.s32 48, %v1053_v4  ;;  %v1083_v21 = vadd.s32 40, %v1053_v4  ;;  %v1088_v24 = vadd.s32 32, %v1053_v4 }
  0x24   : > { %v236_v9 = vadd.f32 0.5, %v1057_v6  ;;  %s1064_s29 = sld [smem:[#allocation2 + %s418_s27]]  ;;  %s272_s30 = sshra.s32 %s1047_s8, 7  ;;  %v1070_v13 = vcvt.s32.f32 %v181_v7  ;;  %v187_v14 = vmul.f32 2.0, %v1061_v8  ;;  %v211_v26 = vcvt.s32.f32 %v205_v19 }
  0x25   : > { %v807_v10 = vpop.eup %806  ;;  %s1067_s3 = sld [smem:[#allocation2 + %s422_s28]]  ;;  %s699_s4 = sshll.u32 %s272_s30, 7  ;;  %v210_v27 = vcvt.s32.f32 %v1080_v20  ;;  %v209_v28 = vcvt.s32.f32 %v1083_v21  ;;  %v208_v31 = vcvt.s32.f32 %v1088_v24  ;;  %v1112_v20 = vadd.s32 24, %v1053_v4 }
  0x26   : > { %v190_v11 = vmul.f32 15.0, %v807_v10  ;;  %v237_v12 = vmul.f32 0.0625, %v236_v9  ;;  %s442_s5 = sadd.f32 1.0, %s1055_s18  ;;  %s700_s6 = sadd.s32 128, %s699_s4  ;;  %vm194_vm0 = vweird.f32 %v807_v10  ;;  %v188_v25 = vmul.f32 2.0, %v1070_v13 }
  0x27   : > { %s277_s7 = sand.u32 127, %s1047_s8  ;;  %s702_s15 = sadd.s32 256, %s699_s4  ;;  %v219_v33 = vadd.f32 0.5, %v211_v26  ;;  %v218_v34 = vadd.f32 0.5, %v210_v27  ;;  %v217_v35 = vadd.f32 0.5, %v209_v28  ;;  %v216_v39 = vadd.f32 0.5, %v208_v31 }
  0x28   : > { %v191_v15 = vsub.f32 1.0, %v190_v11  ;;  %v1074_v16 = vfloor.f32 %v237_v12  ;;  %s278_s20 = sadd.s32 %s700_s6, %s277_s7  ;;  %s282_s23 = sadd.s32 %s702_s15, %s277_s7  ;;  %v443_v32 = vstv %s442_s5 }
  0x29   : > { %s1076_s24 = sld [smem:[#allocation2 + %s278_s20]]  ;;  %v227_v42 = vmul.f32 0.0625, %v219_v33  ;;  %v226_v43 = vmul.f32 0.0625, %v218_v34  ;;  %v225_v47 = vmul.f32 0.0625, %v217_v35  ;;  %v1105_v51 = vmul.f32 0.0625, %v216_v39 }
  0x2a   : > { %v192_v22 = vmul.f32 %v807_v10, %v191_v15  ;;  %v255_v23 = vmul.f32 16.0, %v1074_v16  ;;  %s427_s8 = sadd.f32 1.0, %s1064_s29  ;;  %s708_s29 = sshll.u32 %s931_s12, 5 }
  0x2b   : > { %s283_s25 = sld [smem:[#allocation2 + %s282_s23]]  ;;  %v424_v38 = vstv %s1067_s3  ;;  %v235_v54 = vfloor.f32 %v227_v42  ;;  %v234_v55 = vfloor.f32 %v226_v43  ;;  %v233_v63 = vfloor.f32 %v225_v47  ;;  %s564_s4 = scalar_lea.hbm %s1279_s2, %s708_s29 }
  0x2c   : > { %v193_v29 = vadd.f32 %v807_v10, %v192_v22  ;;  %v256_v30 = vsub.f32 %v1057_v6, %v255_v23  ;;  %s302_s26 = sadd.f32 1.0, %s1051_s16  ;;  %v428_v45 = vstv %s427_s8  ;;  %s173_s16 = sand.u32 1, %s923_s10  }
  0x2d   : > { %v246_v62 = vmul.f32 16.0, %v235_v54  ;;  %vm1119_vm2 = vcmp.eq.f32.partialorder %v235_v54, %v1074_v16  ;;  %vm1129_vm3 = vcmp.eq.f32.partialorder %v234_v55, %v1074_v16  ;;  %vm1134_vm4 = vcmp.eq.f32.partialorder %v233_v63, %v1074_v16  ;;  %s661_s18 = sshll.u32 %s173_s16, 5  ;;  %s567_s6 = sshll.u32 %s564_s4, 4  ;;  %s568_s6 = int_to_ptr.hbm [resolvable:$true] %s567_s6 }
  0x2e   : > { %v195_v36 = vsel %vm194_vm0, %v807_v10, %v193_v29  ;;  %v265_v37 = vmul.f32 2.0, %v256_v30  ;;  %v303_v46 = vstv %s302_s26  ;;  %v245_v10 = vmul.f32 16.0, %v234_v55  ;;  %s175_s28 = scalar_lea.vmem [#allocation7], %s661_s18  ;;  %s551_s7 = scalar_lea.sflag [#allocation4], %s173_s16 }
  0x2f   : > { %v196_v40 = vmul.f32 %v195_v36, %v187_v14  ;;  %v197_v41 = vmul.f32 %v195_v36, %v188_v25  ;;  %s287_s27 = sadd.f32 1.0, %s1076_s24  ;;  %v254_v9 = vsub.f32 %v211_v26, %v246_v62  ;;  %v213_v62 = vadd.f32 0.5, %v1070_v13  ;;  %s565_s5 = sshll.u32 %s175_s28, 4  ;;  %s566_s5 = int_to_ptr.vmem [resolvable:$true] %s565_s5 }
  0x30   : > { %v266_v44 = vmul.f32 %v265_v37, %v195_v36  ;;  %v253_v19 = vsub.f32 %v210_v27, %v245_v10  ;;  %s867_s15 = sshra.s32 %s568_s6, 4  ;;  %s873_s24 = scalar_lea.hbm %s1279_s2, 64  ;;  %s868_s15 = int_to_ptr.hbm [resolvable:$true] %s867_s15 }
  0x31   : > { %v198_v48 = vadd.f32 -1.0, %v196_v40  ;;  %v199_v49 = vadd.f32 -1.0, %v197_v41  ;;  %v284_v50 = vstv %s283_s25  ;;  %v288_v53 = vstv %s287_s27  ;;  %s869_s20 = scalar_lea.hbm %s868_s15, 32  ;;  %p874_p3 = scmp.lt.s32.totalorder %s868_s15, %s1279_s2 }
  0x32   : > { %v267_v52 = vadd.f32 -1.0, %v266_v44  ;;  %p870_p0 = scmp.ne.s32.totalorder %s868_s15, %s869_s20  ;;  %p875_p5 = scmp.lt.s32.totalorder %s873_s24, %s869_s20 }
  0x33   : > { %v425_v56 = vmul.f32 %v424_v38, %v198_v48  ;;  %v426_v57 = vmul.f32 %v424_v38, %v199_v49  ;;  %v285_v58 = vmul.f32 %v284_v50, %v198_v48  ;;  %v286_v59 = vmul.f32 %v284_v50, %v199_v49 }
  0x34   : > { %v441_v60 = vmul.f32 %v424_v38, %v267_v52  ;;  %v301_v61 = vmul.f32 %v284_v50, %v267_v52  ;;  %p871_p1 = pnand %p870_p0, %p1003_p4  ;;  %p876_p6 = por %p875_p5, %p874_p3 }
  0x35   : > { %v429_v0 = vadd.f32 %v428_v45, %v425_v56  ;;  %v430_v1 = vadd.f32 %v428_v45, %v426_v57  ;;  %v289_v2 = vadd.f32 %v288_v53, %v285_v58  ;;  %v290_v3 = vadd.f32 %v288_v53, %v286_v59 }
  0x36   : > { %v444_v5 = vadd.f32 %v443_v32, %v441_v60  ;;  %v304_v7 = vadd.f32 %v303_v46, %v301_v61  ;;  %v244_v32 = vmul.f32 16.0, %v233_v63  ;;  %v232_v56 = vfloor.f32 %v1105_v51  ;;  %p872_p2 = pneg %p871_p1 }
  0x37   : > { %v431_v11 = vmul.f32 7.5, %v429_v0  ;;  %v432_v12 = vmul.f32 7.5, %v430_v1  ;;  %v291_v14 = vmul.f32 7.5, %v289_v2  ;;  %v292_v15 = vmul.f32 7.5, %v290_v3 }
  0x38   : > { %v1107_v17 = vmul.f32 7.5, %v444_v5  ;;  %v1109_v18 = vmul.f32 7.5, %v304_v7  ;;  %v207_v58 = vcvt.s32.f32 %v1112_v20  ;;  %v200_v61 = vadd.s32 16, %v1053_v4  ;;  %p877_p7 = pnand %p876_p6, %p872_p2 }
  0x39   : > { %v433_v22 = vsub.f32 %v431_v11, %v1057_v6  ;;  %v434_v23 = vsub.f32 %v432_v12, %v1057_v6  ;;  %v293_v25 = vsub.f32 %v291_v14, %v1057_v6  ;;  %v294_v26 = vsub.f32 %v292_v15, %v1057_v6 }
  0x3a   : > { %v453_v30 = vsub.f32 %v1107_v17, %v254_v9  ;;  %v452_v27 = vsub.f32 %v1107_v17, %v253_v19  ;;  %v313_v36 = vsub.f32 %v1109_v18, %v254_v9  ;;  %v252_v6 = vsub.f32 %v209_v28, %v244_v32 }
  0x3b   : > { %v435_v33 = vand.u32 2147483647, %v433_v22  ;;  %v436_v34 = vand.u32 2147483647, %v434_v23  ;;  %v295_v35 = vand.u32 2147483647, %v293_v25  ;;  %v312_v57 = vsub.f32 %v1109_v18, %v253_v19 }
  0x3c   : > { %v296_v37 = vand.u32 2147483647, %v294_v26  ;;  %v461_v38 = vand.u32 2147483647, %v453_v30  ;;  %v460_v39 = vand.u32 2147483647, %v452_v27  ;;  %v451_v47 = vsub.f32 %v1107_v17, %v252_v6 }
  0x3d   : > { %v437_v40 = vsub.f32 1.0, %v435_v33  ;;  %v297_v41 = vsub.f32 1.0, %v295_v35  ;;  %v321_v43 = vand.u32 2147483647, %v313_v36  ;;  %v438_v21 = vsub.f32 1.0, %v436_v34 }
  0x3e   : > { %v469_v44 = vsub.f32 1.0, %v461_v38  ;;  %v468_v45 = vsub.f32 1.0, %v460_v39  ;;  %v298_v50 = vsub.f32 1.0, %v296_v37  ;;  %v459_v54 = vand.u32 2147483647, %v451_v47 }
  0x3f   : > { %v439_v48 = vmax.f32 %v437_v40, 0.0  ;;  %v299_v28 = vmax.f32 %v297_v41, 0.0  ;;  %v329_v49 = vsub.f32 1.0, %v321_v43  ;;  %v311_v60 = vsub.f32 %v1109_v18, %v252_v6 }
  0x40   : > { %v477_v52 = vmax.f32 %v469_v44, 0.0  ;;  %v476_v53 = vmax.f32 %v468_v45, 0.0  ;;  %v467_v59 = vsub.f32 1.0, %v459_v54  ;;  %v440_v63 = vmax.f32 %v438_v21, 0.0 }
  0x41   : > { %679 = vmatmul.msk.f32.vlgmr.msra.gmra.mxu2 %vm348_vm1, %v439_v48  ;;  %665 = vmatmul.msk.f32.vlgmr.msra.gmra.mxu0 %vm348_vm1, %v299_v28  ;;  %v337_v55 = vmax.f32 %v329_v49, 0.0  ;;  %v243_v51 = vmul.f32 16.0, %v232_v56  ;;  %v320_v0 = vand.u32 2147483647, %v312_v57  ;;  %v215_v1 = vadd.f32 0.5, %v207_v58 }
  0x42   : > { %681 = vmatpush.msk.msrb.mxu2 %vm1119_vm2, %v477_v52  ;;  %717 = vmatpush.msk.msra.mxu3 %vm1119_vm2, %v477_v52  ;;  %v475_v2 = vmax.f32 %v467_v59, 0.0  ;;  %v319_v3 = vand.u32 2147483647, %v311_v60  ;;  %v206_v4 = vcvt.s32.f32 %v200_v61  ;;  %v1159_v5 = vmul.f32 0.0625, %v213_v62 }
  0x43   : > { %667 = vmatpush.msk.msrb.mxu0 %vm1119_vm2, %v337_v55  ;;  %709 = vmatpush.msk.msra.mxu1 %vm1119_vm2, %v337_v55  ;;  %v300_v7 = vmax.f32 %v298_v50, 0.0  ;;  %v251_v9 = vsub.f32 %v208_v31, %v243_v51  ;;  %v328_v10 = vsub.f32 1.0, %v320_v0  ;;  %v223_v11 = vmul.f32 0.0625, %v215_v1 }
  0x44   : > { %682 = vmatpush.msk.msrb.mxu2 %vm1129_vm3, %v476_v53  ;;  %718 = vmatpush.msk.msra.mxu3 %vm1129_vm3, %v476_v53  ;;  %v327_v12 = vsub.f32 1.0, %v319_v3  ;;  %v214_v14 = vadd.f32 0.5, %v206_v4  ;;  %v229_v15 = vfloor.f32 %v1159_v5  ;;  %vm1178_vm5 = vcmp.eq.f32.partialorder %v232_v56, %v1074_v16 }
  0x45   : > { %v450_v19 = vsub.f32 %v1107_v17, %v251_v9  ;;  %v336_v20 = vmax.f32 %v328_v10, 0.0  ;;  %v231_v22 = vfloor.f32 %v223_v11  ;;  %v310_v23 = vsub.f32 %v1109_v18, %v251_v9 }
  0x46   : > { %683 = vmatpush.msk.msrb.mxu2 %vm1134_vm4, %v475_v2  ;;  %719 = vmatpush.msk.msra.mxu3 %vm1134_vm4, %v475_v2  ;;  %v335_v24 = vmax.f32 %v327_v12, 0.0  ;;  %v222_v31 = vmul.f32 0.0625, %v214_v14  ;;  %v240_v25 = vmul.f32 16.0, %v229_v15  ;;  %vm1205_vm8 = vcmp.eq.f32.partialorder %v229_v15, %v1074_v16 }
  0x47   : > { %v458_v26 = vand.u32 2147483647, %v450_v19  ;;  %v242_v29 = vmul.f32 16.0, %v231_v22  ;;  %v318_v30 = vand.u32 2147483647, %v310_v23  ;;  %668 = vmatpush.msk.msrb.mxu0 %vm1129_vm3, %v336_v20  ;;  %710 = vmatpush.msk.msra.mxu1 %vm1129_vm3, %v336_v20  ;;  %vm260_vm6 = vcmp.eq.f32.partialorder %v231_v22, %v1074_v16 }
  0x48   : > { %v230_v27 = vfloor.f32 %v222_v31  ;;  %v248_v32 = vsub.f32 %v1070_v13, %v240_v25  ;;  %v212_v56 = vadd.f32 0.5, %v1061_v8 }
  0x49   : > { %680 = vmatmul.msk.f32.gmra.mxu2 %vm348_vm1, %v440_v63  ;;  %666 = vmatmul.msk.f32.gmra.mxu0 %vm348_vm1, %v300_v7  ;;  %v466_v33 = vsub.f32 1.0, %v458_v26  ;;  %v250_v34 = vsub.f32 %v207_v58, %v242_v29  ;;  %v326_v35 = vsub.f32 1.0, %v318_v30 }
  0x4a   : > { %669 = vmatpush.msk.msrb.mxu0 %vm1134_vm4, %v335_v24  ;;  %v241_v37 = vmul.f32 16.0, %v230_v27  ;;  %v447_v38 = vsub.f32 %v1107_v17, %v248_v32  ;;  %711 = vmatpush.msk.msra.mxu1 %vm1134_vm4, %v335_v24  ;;  %vm1200_vm7 = vcmp.eq.f32.partialorder %v230_v27, %v1074_v16  ;;  %v220_v57 = vmul.f32 0.0625, %v212_v56 }
  0x4b   : > { %v474_v13 = vmax.f32 %v466_v33, 0.0  ;;  %v449_v39 = vsub.f32 %v1107_v17, %v250_v34  ;;  %v334_v6 = vmax.f32 %v326_v35, 0.0  ;;  %v309_v40 = vsub.f32 %v1109_v18, %v250_v34 }
  0x4c   : > { %v249_v41 = vsub.f32 %v206_v4, %v241_v37  ;;  %v455_v42 = vand.u32 2147483647, %v447_v38  ;;  %v228_v58 = vfloor.f32 %v220_v57  ;;  %v307_v1 = vsub.f32 %v1109_v18, %v248_v32 }
  0x4d   : > { %684 = vmatpush.msk.msrb.mxu2 %vm1178_vm5, %v474_v13  ;;  %v457_v43 = vand.u32 2147483647, %v449_v39  ;;  %670 = vmatpush.msk.msrb.mxu0 %vm1178_vm5, %v334_v6  ;;  %v317_v44 = vand.u32 2147483647, %v309_v40 }
  0x4e   : > { %v448_v45 = vsub.f32 %v1107_v17, %v249_v41  ;;  %720 = vmatpush.msk.msra.mxu3 %vm1178_vm5, %v474_v13  ;;  %712 = vmatpush.msk.msra.mxu1 %vm1178_vm5, %v334_v6  ;;  %v463_v21 = vsub.f32 1.0, %v455_v42  ;;  %v239_v59 = vmul.f32 16.0, %v228_v58  ;;  %v308_v63 = vsub.f32 %v1109_v18, %v249_v41 }
  0x4f   : > { %v465_v46 = vsub.f32 1.0, %v457_v43  ;;  %v325_v47 = vsub.f32 1.0, %v317_v44  ;;  %v315_v4 = vand.u32 2147483647, %v307_v1  ;;  %vm257_vm9 = vcmp.eq.f32.partialorder %v228_v58, %v1074_v16 }
  0x50   : > { %v456_v48 = vand.u32 2147483647, %v448_v45  ;;  %v471_v54 = vmax.f32 %v463_v21, 0.0  ;;  %v247_v60 = vsub.f32 %v1061_v8, %v239_v59  ;;  %v316_v0 = vand.u32 2147483647, %v308_v63 }
  0x51   : > { %v473_v28 = vmax.f32 %v465_v46, 0.0  ;;  %v333_v49 = vmax.f32 %v325_v47, 0.0  ;;  %v323_v9 = vsub.f32 1.0, %v315_v4 }
  0x52   : > { %v464_v50 = vsub.f32 1.0, %v456_v48  ;;  %v446_v61 = vsub.f32 %v1107_v17, %v247_v60  ;;  %v324_v3 = vsub.f32 1.0, %v316_v0  ;;  %v306_v5 = vsub.f32 %v1109_v18, %v247_v60 }
  0x53   : > { %685 = vmatpush.msk.msrb.mxu2 %vm260_vm6, %v473_v28  ;;  %671 = vmatpush.msk.msrb.mxu0 %vm260_vm6, %v333_v49  ;;  %v331_v17 = vmax.f32 %v323_v9, 0.0 }
  0x54   : > { %v472_v53 = vmax.f32 %v464_v50, 0.0  ;;  %721 = vmatpush.msk.msra.mxu3 %vm260_vm6, %v473_v28  ;;  %713 = vmatpush.msk.msra.mxu1 %vm260_vm6, %v333_v49  ;;  %v454_v62 = vand.u32 2147483647, %v446_v61  ;;  %v332_v7 = vmax.f32 %v324_v3, 0.0  ;;  %v314_v8 = vand.u32 2147483647, %v306_v5 }
  0x56   : > { %686 = vmatpush.msk.msrb.mxu2 %vm1200_vm7, %v472_v53  ;;  %722 = vmatpush.msk.msra.mxu3 %vm1200_vm7, %v472_v53  ;;  %v462_v51 = vsub.f32 1.0, %v454_v62  ;;  %v322_v10 = vsub.f32 1.0, %v314_v8 }
  0x57   : > { %672 = vmatpush.msk.msrb.mxu0 %vm1200_vm7, %v332_v7  ;;  %714 = vmatpush.msk.msra.mxu1 %vm1200_vm7, %v332_v7 }
  0x58   : > { %687 = vmatpush.msk.msrb.mxu2 %vm1205_vm8, %v471_v54  ;;  %723 = vmatpush.msk.msra.mxu3 %vm1205_vm8, %v471_v54  ;;  %v470_v2 = vmax.f32 %v462_v51, 0.0  ;;  %v330_v18 = vmax.f32 %v322_v10, 0.0 }
  0x59   : > { %673 = vmatpush.msk.msrb.mxu0 %vm1205_vm8, %v331_v17  ;;  %715 = vmatpush.msk.msra.mxu1 %vm1205_vm8, %v331_v17 }
  0x5a   : > { %688 = vmatpush.msk.msrb.mxu2 %vm257_vm9, %v470_v2  ;;  %724 = vmatpush.msk.msra.mxu3 %vm257_vm9, %v470_v2 }
  0x5b   : > { %674 = vmatpush.msk.msrb.mxu0 %vm257_vm9, %v330_v18  ;;  %716 = vmatpush.msk.msra.mxu1 %vm257_vm9, %v330_v18 }
  0xbe   : > { %v372_v16 = vpop.f32.mrf.mxu0 }
  0xbf   : > { %675 = vmatmul.msk.f32.vlgmr.msrb.gmra.mxu0 %vm378_vm10, %v372_v16 }
  0xc4   : > { %v512_v11 = vpop.f32.mrf.mxu2 }
  0xc5   : > { %689 = vmatmul.msk.f32.vlgmr.msrb.gmra.mxu2 %vm378_vm10, %v512_v11 }
  0xc6   : > { %v375_v12 = vpop.f32.mrf.mxu0 }
  0xc7   : > { %676 = vmatmul.msk.f32.vlgmr.msra.gmra.mxu1 %vm378_vm10, %v375_v12 }
  0xcc   : > { %v515_v14 = vpop.f32.mrf.mxu2 }
  0xcd   : > { %690 = vmatmul.msk.f32.vlgmr.msra.gmra.mxu3 %vm378_vm10, %v515_v14 }
 0x13c   : > { %v402_v15 = vpop.f32.mrf.mxu0 }
 0x13d   : > { %408 = vst.msk [vmem:[%s175_s28] sm:$0xff] %vm378_vm10, %v402_v15 }
 0x144   : > { %v405_v19 = vpop.f32.mrf.mxu1 }
 0x145   : > { %409 = vst.msk [vmem:[%s175_s28 + $0x8] sm:$0xff] %vm378_vm10, %v405_v19 }
 0x148   : > { %v541_v20 = vpop.f32.mrf.mxu2 }
 0x149   : > { %691 = vst.msk [vmem:[%s175_s28 + $0x10] sm:$0xff] %vm378_vm10, %v541_v20 }
 0x150   : > { %v544_v22 = vpop.f32.mrf.mxu3 }
 0x151   : > { %692 = vst.msk [vmem:[%s175_s28 + $0x18] sm:$0xff] %vm378_vm10, %v544_v22 }
 0x152   : > { %880 = shalt.err (!%p877_p7)
}
 0x153   : > { %s946_s26 = smov 128   ;;  %s947_s27 = smov 8  }
 0x154   : > { %733 = dma.vmem_to_hbm [thread:$0]  (%p1003_p4), %s566_s5, 512, %s568_s6, %s551_s7, %s946_s26, %s946_s26, %s947_s27  }
 0x155 PF: > { %p750_p9 = scmp.ge.s32.totalorder %s939_s14, 2  ;;  %s582_s16 = sand.u32 1, %s919_s9  }
 0x156   : > { %s583_s18 = scalar_lea.sflag [#allocation4], %s582_s16 }
 0x157   : > { %p743_p10 = pnand %p750_p9, %p1010_p8 }
 0x159   : > { %p744_p11 = pneg %p743_p10 }
 0x15b   : > { %914 = dma.done.wait (%p744_p11), %s583_s18, 512  }
 0x15c   : > { %916 = vsyncadd (%p744_p11), %s583_s18, 4294966784  ;;  %s17_s14 = sadd.s32 1, %s939_s14   ;;  %s1296_s9 = smov %s923_s10 }
 0x15d   : > { %p14_p12 = scmp.ge.s32.totalorder %s17_s14, 4   ;;  %s1297_s10 = smov %s927_s11 }
 0x15e   : > { %s1298_s11 = smov %s1016_s22  ;;  %s1299_s12 = smov %s935_s13 }
 0x15f   : > { %s1300_s13 = smov %s1302_s17  ;;  %16 = sbr.rel (!%p14_p12) target bundleno = 6 (0x6), region = 73 }
 0x164   :  { %589 = vsyncpa [#allocation3], 1 }
 0x165   :  { %591 = vsyncpa [#allocation3 + $0x1], 1 }
 0x166   :  { %592 = vsyncpa [#allocation4], 1 }
 0x167   :  { %594 = vsyncpa [#allocation4 + $0x1], 1 }
 0x168   :  { %595 = vsyncpa [#allocation5], 1 }
 0x169   :  { %597 = vsyncpa [#allocation5 + $0x1], 1 }

</bundles_post_ra>
